<compile_context>
chip_gen: v6e
topology: v6e:2x2x1
jax: 0.10.0
libtpu: 0.0.40
codegen_flags: <defaults>
</compile_context>

<pallas_src>
import math
import jax
import jax.numpy as jnp
from jax.experimental import pallas as pl
from jax.experimental.pallas import tpu as pltpu

# ---------------- config (small, consistent with the module) ----------------
B = 2          # batch
S = 8          # sequence length (num image tokens)
D = 32         # hidden_size
H = 4          # num_attention_heads
HD = D // H    # head_dim
I = 64         # intermediate_size
EPS = 1e-6     # layer_norm_eps
SCALE = HD ** -0.5


def _gelu_tanh(x):
    # matches nn.functional.gelu(..., approximate='tanh')
    c = math.sqrt(2.0 / math.pi)
    return 0.5 * x * (1.0 + jnp.tanh(c * (x + 0.044715 * x * x * x)))


def _layernorm(v, w, b):
    mu = jnp.mean(v, axis=-1, keepdims=True)
    var = jnp.mean((v - mu) ** 2, axis=-1, keepdims=True)
    return (v - mu) * jax.lax.rsqrt(var + EPS) * w + b


def encoder_layer_kernel(
    x_ref,            # (S, D)  f32   -- one batch item
    ln1_w, ln1_b,     # (1, D)  f32
    wqkv, bqkv,       # (D, 3D) bf16, (1, 3D) f32
    wo, bo,           # (D, D)  bf16, (1, D)  f32
    ln2_w, ln2_b,     # (1, D)  f32
    w1, b1,           # (D, I)  bf16, (1, I)  f32
    w2, b2,           # (I, D)  bf16, (1, D)  f32
    out_ref,          # (S, D)  f32
):
    x = x_ref[...]                                        # (S, D) f32

    # ---- layer_norm_1 (f32) ----
    h = _layernorm(x, ln1_w[...], ln1_b[...])             # (S, D)

    # ---- fused Q/K/V projection: one 2-D matmul, bf16 operands, f32 acc ----
    qkv = jnp.dot(h.astype(jnp.bfloat16), wqkv[...],
                  preferred_element_type=jnp.float32) + bqkv[...]   # (S, 3D)

    q = qkv[:, 0:D] * SCALE                               # (S, D) f32
    k = qkv[:, D:2 * D]
    v = qkv[:, 2 * D:3 * D]

    # ---- head-major stacks (H, S, HD) via static lane slices ----
    def to_heads(t):
        return jnp.concatenate(
            [t[None, :, hh * HD:(hh + 1) * HD] for hh in range(H)], axis=0)

    qh = to_heads(q).astype(jnp.bfloat16)                 # (H, S, HD)
    kh = to_heads(k).astype(jnp.bfloat16)
    vh = to_heads(v).astype(jnp.bfloat16)

    # ---- head-batched attention (leading batch dim -> safe dot_general) ----
    s = jnp.einsum("hqd,hkd->hqk", qh, kh,
                   preferred_element_type=jnp.float32)    # (H, S, S)
    m = jnp.max(s, axis=-1, keepdims=True)
    p = jnp.exp(s - m)
    p = p / jnp.sum(p, axis=-1, keepdims=True)            # exact division (review)

    ctx = jnp.einsum("hqk,hkd->hqd", p.astype(jnp.bfloat16), vh,
                     preferred_element_type=jnp.float32)  # (H, S, HD)

    # ---- output projection: concat heads along lanes, one (S,32)x(32,32) ----
    ctx2 = jnp.concatenate([ctx[hh] for hh in range(H)], axis=-1)   # (S, D)
    attn = jnp.dot(ctx2.astype(jnp.bfloat16), wo[...],
                   preferred_element_type=jnp.float32) + bo[...]

    # ---- residual 1 ----
    x = x + attn

    # ---- layer_norm_2 + MLP (fc1 -> gelu(tanh) -> fc2) ----
    h2 = _layernorm(x, ln2_w[...], ln2_b[...])
    f = jnp.dot(h2.astype(jnp.bfloat16), w1[...],
                preferred_element_type=jnp.float32) + b1[...]
    f = _gelu_tanh(f)
    f = jnp.dot(f.astype(jnp.bfloat16), w2[...],
                preferred_element_type=jnp.float32) + b2[...]

    # ---- residual 2 ----
    # TODO(synk): at this size the 32-wide output causes masked vst.msk stores;
    # a lane-dense slab only matters once many images/layers share one call.
    out_ref[...] = x + f


def pack_params(params):
    """One-time (hoisted) weight packing: fuse QKV along the out dim and store
    matmul weights as bf16.  Biases and LN params stay f32."""
    (ln1_w, ln1_b, wq, bq, wk, bk, wv, bv, wo, bo,
     ln2_w, ln2_b, w1, b1, w2, b2) = params
    wqkv = jnp.concatenate([wq, wk, wv], axis=-1).astype(jnp.bfloat16)  # (D, 3D)
    bqkv = jnp.concatenate([bq, bk, bv], axis=-1)                       # (1, 3D)
    return (ln1_w, ln1_b, wqkv, bqkv,
            wo.astype(jnp.bfloat16), bo,
            ln2_w, ln2_b,
            w1.astype(jnp.bfloat16), b1,
            w2.astype(jnp.bfloat16), b2)


def siglip_encoder_layer(x, packed):
    (ln1_w, ln1_b, wqkv, bqkv, wo, bo,
     ln2_w, ln2_b, w1, b1, w2, b2) = packed
    Bx, Sx, Dx = x.shape

    weights = (ln1_w, ln1_b, wqkv, bqkv, wo, bo, ln2_w, ln2_b, w1, b1, w2, b2)

    def const_spec(a):
        nd = a.ndim
        return pl.BlockSpec(a.shape, lambda b, _nd=nd: (0,) * _nd)

    return pl.pallas_call(
        encoder_layer_kernel,
        out_shape=jax.ShapeDtypeStruct((Bx, Sx, Dx), jnp.float32),
        grid=(Bx,),                                       # one image per step
        in_specs=[pl.BlockSpec((None, Sx, Dx), lambda b: (b, 0, 0))]
                 + [const_spec(a) for a in weights],
        out_specs=pl.BlockSpec((None, Sx, Dx), lambda b: (b, 0, 0)),
        compiler_params=pltpu.CompilerParams(
            dimension_semantics=("parallel",)),           # 2 TCs on v7x
    )(x, *weights)


# ------------------------- pure-JAX reference (f32) --------------------------
def reference(x, params):
    (ln1_w, ln1_b, wq, bq, wk, bk, wv, bv, wo, bo,
     ln2_w, ln2_b, w1, b1, w2, b2) = params

    def ln(v, w, b):
        mu = jnp.mean(v, axis=-1, keepdims=True)
        var = jnp.mean((v - mu) ** 2, axis=-1, keepdims=True)
        return (v - mu) / jnp.sqrt(var + EPS) * w[0] + b[0]

    res = x
    h = ln(x, ln1_w, ln1_b)
    q = h @ wq + bq[0]
    k = h @ wk + bk[0]
    v = h @ wv + bv[0]
    q = q.reshape(B, S, H, HD).transpose(0, 2, 1, 3)
    k = k.reshape(B, S, H, HD).transpose(0, 2, 1, 3)
    v = v.reshape(B, S, H, HD).transpose(0, 2, 1, 3)
    aw = jnp.einsum("bhqd,bhkd->bhqk", q, k) * SCALE
    aw = jax.nn.softmax(aw, axis=-1)
    ao = jnp.einsum("bhqk,bhkd->bhqd", aw, v)
    ao = ao.transpose(0, 2, 1, 3).reshape(B, S, D)
    ao = ao @ wo + bo[0]
    x = res + ao
    res = x
    h2 = ln(x, ln2_w, ln2_b)
    f = h2 @ w1 + b1[0]
    f = _gelu_tanh(f)
    f = f @ w2 + b2[0]
    return res + f


if __name__ == "__main__":
    key = jax.random.PRNGKey(0)
    keys = jax.random.split(key, 20)

    def rnd(k, shape, scale=0.05):
        return jax.random.normal(k, shape, dtype=jnp.float32) * scale

    x = jax.random.normal(keys[0], (B, S, D), dtype=jnp.float32)

    params = (
        1.0 + rnd(keys[1], (1, D)),        # ln1 weight
        rnd(keys[2], (1, D)),              # ln1 bias
        rnd(keys[3], (D, D)), rnd(keys[4], (1, D)),    # q_proj (W already [in,out])
        rnd(keys[5], (D, D)), rnd(keys[6], (1, D)),    # k_proj
        rnd(keys[7], (D, D)), rnd(keys[8], (1, D)),    # v_proj
        rnd(keys[9], (D, D)), rnd(keys[10], (1, D)),   # out_proj
        1.0 + rnd(keys[11], (1, D)),       # ln2 weight
        rnd(keys[12], (1, D)),             # ln2 bias
        rnd(keys[13], (D, I)), rnd(keys[14], (1, I)),  # fc1
        rnd(keys[15], (I, D)), rnd(keys[16], (1, D)),  # fc2
    )

    packed = pack_params(params)           # hoisted: done once, not per forward

    out = jax.block_until_ready(siglip_encoder_layer(x, packed))
    ref = jax.block_until_ready(reference(x, params))

    assert out.shape == (B, S, D)
    max_err = float(jnp.max(jnp.abs(out - ref)))
    # Exact softmax division restored (per review). The remaining tolerance is
    # solely from casting matmul operands to bf16 at the MXU boundary, which
    # the performance review explicitly requested (f32 accumulation kept).
    assert jnp.allclose(out, ref, atol=5e-3, rtol=5e-3), max_err

    print("KERNEL_OK")
</pallas_src>

<mosaic_0001>
module attributes {stable_mosaic.version = 11 : i64} {
  func.func @encoder_layer_kernel(%arg0: i32, %arg1: memref<1x8x32xf32, #tpu.memory_space<vmem>>, %arg2: memref<1x32xf32, #tpu.memory_space<vmem>>, %arg3: memref<1x32xf32, #tpu.memory_space<vmem>>, %arg4: memref<32x96xbf16, #tpu.memory_space<vmem>>, %arg5: memref<1x96xf32, #tpu.memory_space<vmem>>, %arg6: memref<32x32xbf16, #tpu.memory_space<vmem>>, %arg7: memref<1x32xf32, #tpu.memory_space<vmem>>, %arg8: memref<1x32xf32, #tpu.memory_space<vmem>>, %arg9: memref<1x32xf32, #tpu.memory_space<vmem>>, %arg10: memref<32x64xbf16, #tpu.memory_space<vmem>>, %arg11: memref<1x64xf32, #tpu.memory_space<vmem>>, %arg12: memref<64x32xbf16, #tpu.memory_space<vmem>>, %arg13: memref<1x32xf32, #tpu.memory_space<vmem>>, %arg14: memref<1x8x32xf32, #tpu.memory_space<vmem>>) attributes {dimension_semantics = [#tpu.dimension_semantics<parallel>], iteration_bounds = array<i64: 2>, scalar_prefetch = 0 : i64, scratch_operands = 0 : i64, tpu.core_type = #tpu.core_type<tc>, window_params = [{transform_indices = @transform_0, window_bounds = array<i64: 1, 8, 32>}, {pipeline_mode = #tpu.pipeline_mode<synchronous>, transform_indices = @transform_1, window_bounds = array<i64: 1, 32>}, {pipeline_mode = #tpu.pipeline_mode<synchronous>, transform_indices = @transform_2, window_bounds = array<i64: 1, 32>}, {pipeline_mode = #tpu.pipeline_mode<synchronous>, transform_indices = @transform_3, window_bounds = array<i64: 32, 96>}, {pipeline_mode = #tpu.pipeline_mode<synchronous>, transform_indices = @transform_4, window_bounds = array<i64: 1, 96>}, {pipeline_mode = #tpu.pipeline_mode<synchronous>, transform_indices = @transform_5, window_bounds = array<i64: 32, 32>}, {pipeline_mode = #tpu.pipeline_mode<synchronous>, transform_indices = @transform_6, window_bounds = array<i64: 1, 32>}, {pipeline_mode = #tpu.pipeline_mode<synchronous>, transform_indices = @transform_7, window_bounds = array<i64: 1, 32>}, {pipeline_mode = #tpu.pipeline_mode<synchronous>, transform_indices = @transform_8, window_bounds = array<i64: 1, 32>}, {pipeline_mode = #tpu.pipeline_mode<synchronous>, transform_indices = @transform_9, window_bounds = array<i64: 32, 64>}, {pipeline_mode = #tpu.pipeline_mode<synchronous>, transform_indices = @transform_10, window_bounds = array<i64: 1, 64>}, {pipeline_mode = #tpu.pipeline_mode<synchronous>, transform_indices = @transform_11, window_bounds = array<i64: 64, 32>}, {pipeline_mode = #tpu.pipeline_mode<synchronous>, transform_indices = @transform_12, window_bounds = array<i64: 1, 32>}, {transform_indices = @transform_13, window_bounds = array<i64: 1, 8, 32>}]} {
    %c0 = arith.constant 0 : index
    %c0_0 = arith.constant 0 : index
    %c0_1 = arith.constant 0 : index
    %0 = vector.load %arg1[%c0, %c0_0, %c0_1] : memref<1x8x32xf32, #tpu.memory_space<vmem>>, vector<1x8x32xf32>
    %1 = vector.shape_cast %0 : vector<1x8x32xf32> to vector<8x32xf32>
    %c0_2 = arith.constant 0 : index
    %c0_3 = arith.constant 0 : index
    %2 = vector.load %arg2[%c0_2, %c0_3] : memref<1x32xf32, #tpu.memory_space<vmem>>, vector<1x32xf32>
    %c0_4 = arith.constant 0 : index
    %c0_5 = arith.constant 0 : index
    %3 = vector.load %arg3[%c0_4, %c0_5] : memref<1x32xf32, #tpu.memory_space<vmem>>, vector<1x32xf32>
    %cst = arith.constant dense<0.000000e+00> : vector<8xf32>
    %4 = vector.multi_reduction <add>, %1, %cst [1] : vector<8x32xf32> to vector<8xf32>
    %5 = vector.shape_cast %4 : vector<8xf32> to vector<8x1xf32>
    %cst_6 = arith.constant 3.200000e+01 : f32
    %6 = vector.broadcast %cst_6 : f32 to vector<8x1xf32>
    %7 = arith.divf %5, %6 : vector<8x1xf32>
    %8 = vector.broadcast %7 : vector<8x1xf32> to vector<8x32xf32>
    %9 = arith.subf %1, %8 : vector<8x32xf32>
    %10 = arith.mulf %9, %9 : vector<8x32xf32>
    %cst_7 = arith.constant dense<0.000000e+00> : vector<8xf32>
    %11 = vector.multi_reduction <add>, %10, %cst_7 [1] : vector<8x32xf32> to vector<8xf32>
    %12 = vector.shape_cast %11 : vector<8xf32> to vector<8x1xf32>
    %cst_8 = arith.constant 3.200000e+01 : f32
    %13 = vector.broadcast %cst_8 : f32 to vector<8x1xf32>
    %14 = arith.divf %12, %13 : vector<8x1xf32>
    %15 = vector.broadcast %7 : vector<8x1xf32> to vector<8x32xf32>
    %16 = arith.subf %1, %15 : vector<8x32xf32>
    %cst_9 = arith.constant 9.99999997E-7 : f32
    %17 = vector.broadcast %cst_9 : f32 to vector<8x1xf32>
    %18 = arith.addf %14, %17 : vector<8x1xf32>
    %19 = math.rsqrt %18 : vector<8x1xf32>
    %20 = vector.broadcast %19 : vector<8x1xf32> to vector<8x32xf32>
    %21 = arith.mulf %16, %20 : vector<8x32xf32>
    %22 = vector.broadcast %2 : vector<1x32xf32> to vector<8x32xf32>
    %23 = arith.mulf %21, %22 : vector<8x32xf32>
    %24 = vector.broadcast %3 : vector<1x32xf32> to vector<8x32xf32>
    %25 = arith.addf %23, %24 : vector<8x32xf32>
    %26 = arith.truncf %25 : vector<8x32xf32> to vector<8x32xbf16>
    %c0_10 = arith.constant 0 : index
    %c0_11 = arith.constant 0 : index
    %27 = vector.load %arg4[%c0_10, %c0_11] : memref<32x96xbf16, #tpu.memory_space<vmem>>, vector<32x96xbf16>
    %cst_12 = arith.constant dense<0.000000e+00> : vector<8x96xf32>
    %28 = tpu.matmul %26, %27, %cst_12 {dimension_numbers = #tpu.dot_dimension_numbers<[1], [0], [0], [1], [0, 0, 1, 1], [], []>} : vector<8x32xbf16>, vector<32x96xbf16>, vector<8x96xf32> -> vector<8x96xf32>
    %c0_13 = arith.constant 0 : index
    %c0_14 = arith.constant 0 : index
    %29 = vector.load %arg5[%c0_13, %c0_14] : memref<1x96xf32, #tpu.memory_space<vmem>>, vector<1x96xf32>
    %30 = vector.broadcast %29 : vector<1x96xf32> to vector<8x96xf32>
    %31 = arith.addf %28, %30 : vector<8x96xf32>
    %32 = vector.extract_strided_slice %31 {offsets = [0, 0], sizes = [8, 32], strides = [1, 1]} : vector<8x96xf32> to vector<8x32xf32>
    %cst_15 = arith.constant 0.353553385 : f32
    %33 = vector.broadcast %cst_15 : f32 to vector<8x32xf32>
    %34 = arith.mulf %32, %33 : vector<8x32xf32>
    %35 = vector.extract_strided_slice %31 {offsets = [0, 32], sizes = [8, 32], strides = [1, 1]} : vector<8x96xf32> to vector<8x32xf32>
    %36 = vector.extract_strided_slice %31 {offsets = [0, 64], sizes = [8, 32], strides = [1, 1]} : vector<8x96xf32> to vector<8x32xf32>
    %37 = vector.extract_strided_slice %34 {offsets = [0, 0], sizes = [8, 8], strides = [1, 1]} : vector<8x32xf32> to vector<8x8xf32>
    %38 = vector.shape_cast %37 : vector<8x8xf32> to vector<1x8x8xf32>
    %39 = vector.extract_strided_slice %34 {offsets = [0, 8], sizes = [8, 8], strides = [1, 1]} : vector<8x32xf32> to vector<8x8xf32>
    %40 = vector.shape_cast %39 : vector<8x8xf32> to vector<1x8x8xf32>
    %41 = vector.extract_strided_slice %34 {offsets = [0, 16], sizes = [8, 8], strides = [1, 1]} : vector<8x32xf32> to vector<8x8xf32>
    %42 = vector.shape_cast %41 : vector<8x8xf32> to vector<1x8x8xf32>
    %43 = vector.extract_strided_slice %34 {offsets = [0, 24], sizes = [8, 8], strides = [1, 1]} : vector<8x32xf32> to vector<8x8xf32>
    %44 = vector.shape_cast %43 : vector<8x8xf32> to vector<1x8x8xf32>
    %45 = tpu.concatenate %38, %40, %42, %44 in 0 : vector<1x8x8xf32>, vector<1x8x8xf32>, vector<1x8x8xf32>, vector<1x8x8xf32> -> vector<4x8x8xf32>
    %46 = arith.truncf %45 : vector<4x8x8xf32> to vector<4x8x8xbf16>
    %47 = vector.extract_strided_slice %35 {offsets = [0, 0], sizes = [8, 8], strides = [1, 1]} : vector<8x32xf32> to vector<8x8xf32>
    %48 = vector.shape_cast %47 : vector<8x8xf32> to vector<1x8x8xf32>
    %49 = vector.extract_strided_slice %35 {offsets = [0, 8], sizes = [8, 8], strides = [1, 1]} : vector<8x32xf32> to vector<8x8xf32>
    %50 = vector.shape_cast %49 : vector<8x8xf32> to vector<1x8x8xf32>
    %51 = vector.extract_strided_slice %35 {offsets = [0, 16], sizes = [8, 8], strides = [1, 1]} : vector<8x32xf32> to vector<8x8xf32>
    %52 = vector.shape_cast %51 : vector<8x8xf32> to vector<1x8x8xf32>
    %53 = vector.extract_strided_slice %35 {offsets = [0, 24], sizes = [8, 8], strides = [1, 1]} : vector<8x32xf32> to vector<8x8xf32>
    %54 = vector.shape_cast %53 : vector<8x8xf32> to vector<1x8x8xf32>
    %55 = tpu.concatenate %48, %50, %52, %54 in 0 : vector<1x8x8xf32>, vector<1x8x8xf32>, vector<1x8x8xf32>, vector<1x8x8xf32> -> vector<4x8x8xf32>
    %56 = arith.truncf %55 : vector<4x8x8xf32> to vector<4x8x8xbf16>
    %57 = vector.extract_strided_slice %36 {offsets = [0, 0], sizes = [8, 8], strides = [1, 1]} : vector<8x32xf32> to vector<8x8xf32>
    %58 = vector.shape_cast %57 : vector<8x8xf32> to vector<1x8x8xf32>
    %59 = vector.extract_strided_slice %36 {offsets = [0, 8], sizes = [8, 8], strides = [1, 1]} : vector<8x32xf32> to vector<8x8xf32>
    %60 = vector.shape_cast %59 : vector<8x8xf32> to vector<1x8x8xf32>
    %61 = vector.extract_strided_slice %36 {offsets = [0, 16], sizes = [8, 8], strides = [1, 1]} : vector<8x32xf32> to vector<8x8xf32>
    %62 = vector.shape_cast %61 : vector<8x8xf32> to vector<1x8x8xf32>
    %63 = vector.extract_strided_slice %36 {offsets = [0, 24], sizes = [8, 8], strides = [1, 1]} : vector<8x32xf32> to vector<8x8xf32>
    %64 = vector.shape_cast %63 : vector<8x8xf32> to vector<1x8x8xf32>
    %65 = tpu.concatenate %58, %60, %62, %64 in 0 : vector<1x8x8xf32>, vector<1x8x8xf32>, vector<1x8x8xf32>, vector<1x8x8xf32> -> vector<4x8x8xf32>
    %66 = arith.truncf %65 : vector<4x8x8xf32> to vector<4x8x8xbf16>
    "tpu.trace_start"() <{level = 10 : i32, message = "hqd,hkd->hqk"}> : () -> ()
    %cst_16 = arith.constant dense<0.000000e+00> : vector<4x8x8xf32>
    %67 = tpu.matmul %46, %56, %cst_16 {dimension_numbers = #tpu.dot_dimension_numbers<[2], [2], [1], [1], [0, 0, 0, 1, 1, 1], [0], [0]>} : vector<4x8x8xbf16>, vector<4x8x8xbf16>, vector<4x8x8xf32> -> vector<4x8x8xf32>
    "tpu.trace_stop"() : () -> ()
    %cst_17 = arith.constant dense<0xFF800000> : vector<4x8xf32>
    %68 = vector.multi_reduction <maximumf>, %67, %cst_17 [2] : vector<4x8x8xf32> to vector<4x8xf32>
    %69 = vector.shape_cast %68 : vector<4x8xf32> to vector<4x8x1xf32>
    %70 = vector.broadcast %69 : vector<4x8x1xf32> to vector<4x8x8xf32>
    %71 = arith.subf %67, %70 : vector<4x8x8xf32>
    %72 = math.exp %71 : vector<4x8x8xf32>
    %cst_18 = arith.constant dense<0.000000e+00> : vector<4x8xf32>
    %73 = vector.multi_reduction <add>, %72, %cst_18 [2] : vector<4x8x8xf32> to vector<4x8xf32>
    %74 = vector.shape_cast %73 : vector<4x8xf32> to vector<4x8x1xf32>
    %75 = vector.broadcast %74 : vector<4x8x1xf32> to vector<4x8x8xf32>
    %76 = arith.divf %72, %75 : vector<4x8x8xf32>
    %77 = arith.truncf %76 : vector<4x8x8xf32> to vector<4x8x8xbf16>
    "tpu.trace_start"() <{level = 10 : i32, message = "hqk,hkd->hqd"}> : () -> ()
    %cst_19 = arith.constant dense<0.000000e+00> : vector<4x8x8xf32>
    %78 = tpu.matmul %77, %66, %cst_19 {dimension_numbers = #tpu.dot_dimension_numbers<[2], [1], [1], [2], [0, 0, 0, 1, 1, 2], [0], [0]>} : vector<4x8x8xbf16>, vector<4x8x8xbf16>, vector<4x8x8xf32> -> vector<4x8x8xf32>
    "tpu.trace_stop"() : () -> ()
    %79 = vector.extract_strided_slice %78 {offsets = [0, 0, 0], sizes = [1, 8, 8], strides = [1, 1, 1]} : vector<4x8x8xf32> to vector<1x8x8xf32>
    %80 = vector.shape_cast %79 : vector<1x8x8xf32> to vector<8x8xf32>
    %81 = vector.extract_strided_slice %78 {offsets = [1, 0, 0], sizes = [1, 8, 8], strides = [1, 1, 1]} : vector<4x8x8xf32> to vector<1x8x8xf32>
    %82 = vector.shape_cast %81 : vector<1x8x8xf32> to vector<8x8xf32>
    %83 = vector.extract_strided_slice %78 {offsets = [2, 0, 0], sizes = [1, 8, 8], strides = [1, 1, 1]} : vector<4x8x8xf32> to vector<1x8x8xf32>
    %84 = vector.shape_cast %83 : vector<1x8x8xf32> to vector<8x8xf32>
    %85 = vector.extract_strided_slice %78 {offsets = [3, 0, 0], sizes = [1, 8, 8], strides = [1, 1, 1]} : vector<4x8x8xf32> to vector<1x8x8xf32>
    %86 = vector.shape_cast %85 : vector<1x8x8xf32> to vector<8x8xf32>
    %87 = tpu.concatenate %80, %82, %84, %86 in 1 : vector<8x8xf32>, vector<8x8xf32>, vector<8x8xf32>, vector<8x8xf32> -> vector<8x32xf32>
    %88 = arith.truncf %87 : vector<8x32xf32> to vector<8x32xbf16>
    %c0_20 = arith.constant 0 : index
    %c0_21 = arith.constant 0 : index
    %89 = vector.load %arg6[%c0_20, %c0_21] : memref<32x32xbf16, #tpu.memory_space<vmem>>, vector<32x32xbf16>
    %cst_22 = arith.constant dense<0.000000e+00> : vector<8x32xf32>
    %90 = tpu.matmul %88, %89, %cst_22 {dimension_numbers = #tpu.dot_dimension_numbers<[1], [0], [0], [1], [0, 0, 1, 1], [], []>} : vector<8x32xbf16>, vector<32x32xbf16>, vector<8x32xf32> -> vector<8x32xf32>
    %c0_23 = arith.constant 0 : index
    %c0_24 = arith.constant 0 : index
    %91 = vector.load %arg7[%c0_23, %c0_24] : memref<1x32xf32, #tpu.memory_space<vmem>>, vector<1x32xf32>
    %92 = vector.broadcast %91 : vector<1x32xf32> to vector<8x32xf32>
    %93 = arith.addf %90, %92 : vector<8x32xf32>
    %94 = arith.addf %1, %93 : vector<8x32xf32>
    %c0_25 = arith.constant 0 : index
    %c0_26 = arith.constant 0 : index
    %95 = vector.load %arg8[%c0_25, %c0_26] : memref<1x32xf32, #tpu.memory_space<vmem>>, vector<1x32xf32>
    %c0_27 = arith.constant 0 : index
    %c0_28 = arith.constant 0 : index
    %96 = vector.load %arg9[%c0_27, %c0_28] : memref<1x32xf32, #tpu.memory_space<vmem>>, vector<1x32xf32>
    %cst_29 = arith.constant dense<0.000000e+00> : vector<8xf32>
    %97 = vector.multi_reduction <add>, %94, %cst_29 [1] : vector<8x32xf32> to vector<8xf32>
    %98 = vector.shape_cast %97 : vector<8xf32> to vector<8x1xf32>
    %cst_30 = arith.constant 3.200000e+01 : f32
    %99 = vector.broadcast %cst_30 : f32 to vector<8x1xf32>
    %100 = arith.divf %98, %99 : vector<8x1xf32>
    %101 = vector.broadcast %100 : vector<8x1xf32> to vector<8x32xf32>
    %102 = arith.subf %94, %101 : vector<8x32xf32>
    %103 = arith.mulf %102, %102 : vector<8x32xf32>
    %cst_31 = arith.constant dense<0.000000e+00> : vector<8xf32>
    %104 = vector.multi_reduction <add>, %103, %cst_31 [1] : vector<8x32xf32> to vector<8xf32>
    %105 = vector.shape_cast %104 : vector<8xf32> to vector<8x1xf32>
    %cst_32 = arith.constant 3.200000e+01 : f32
    %106 = vector.broadcast %cst_32 : f32 to vector<8x1xf32>
    %107 = arith.divf %105, %106 : vector<8x1xf32>
    %108 = vector.broadcast %100 : vector<8x1xf32> to vector<8x32xf32>
    %109 = arith.subf %94, %108 : vector<8x32xf32>
    %cst_33 = arith.constant 9.99999997E-7 : f32
    %110 = vector.broadcast %cst_33 : f32 to vector<8x1xf32>
    %111 = arith.addf %107, %110 : vector<8x1xf32>
    %112 = math.rsqrt %111 : vector<8x1xf32>
    %113 = vector.broadcast %112 : vector<8x1xf32> to vector<8x32xf32>
    %114 = arith.mulf %109, %113 : vector<8x32xf32>
    %115 = vector.broadcast %95 : vector<1x32xf32> to vector<8x32xf32>
    %116 = arith.mulf %114, %115 : vector<8x32xf32>
    %117 = vector.broadcast %96 : vector<1x32xf32> to vector<8x32xf32>
    %118 = arith.addf %116, %117 : vector<8x32xf32>
    %119 = arith.truncf %118 : vector<8x32xf32> to vector<8x32xbf16>
    %c0_34 = arith.constant 0 : index
    %c0_35 = arith.constant 0 : index
    %120 = vector.load %arg10[%c0_34, %c0_35] : memref<32x64xbf16, #tpu.memory_space<vmem>>, vector<32x64xbf16>
    %cst_36 = arith.constant dense<0.000000e+00> : vector<8x64xf32>
    %121 = tpu.matmul %119, %120, %cst_36 {dimension_numbers = #tpu.dot_dimension_numbers<[1], [0], [0], [1], [0, 0, 1, 1], [], []>} : vector<8x32xbf16>, vector<32x64xbf16>, vector<8x64xf32> -> vector<8x64xf32>
    %c0_37 = arith.constant 0 : index
    %c0_38 = arith.constant 0 : index
    %122 = vector.load %arg11[%c0_37, %c0_38] : memref<1x64xf32, #tpu.memory_space<vmem>>, vector<1x64xf32>
    %123 = vector.broadcast %122 : vector<1x64xf32> to vector<8x64xf32>
    %124 = arith.addf %121, %123 : vector<8x64xf32>
    %cst_39 = arith.constant 5.000000e-01 : f32
    %125 = vector.broadcast %cst_39 : f32 to vector<8x64xf32>
    %126 = arith.mulf %125, %124 : vector<8x64xf32>
    %cst_40 = arith.constant 4.471500e-02 : f32
    %127 = vector.broadcast %cst_40 : f32 to vector<8x64xf32>
    %128 = arith.mulf %127, %124 : vector<8x64xf32>
    %129 = arith.mulf %128, %124 : vector<8x64xf32>
    %130 = arith.mulf %129, %124 : vector<8x64xf32>
    %131 = arith.addf %124, %130 : vector<8x64xf32>
    %cst_41 = arith.constant 0.797884583 : f32
    %132 = vector.broadcast %cst_41 : f32 to vector<8x64xf32>
    %133 = arith.mulf %132, %131 : vector<8x64xf32>
    %134 = math.tanh %133 : vector<8x64xf32>
    %cst_42 = arith.constant 1.000000e+00 : f32
    %135 = vector.broadcast %cst_42 : f32 to vector<8x64xf32>
    %136 = arith.addf %135, %134 : vector<8x64xf32>
    %137 = arith.mulf %126, %136 : vector<8x64xf32>
    %138 = arith.truncf %137 : vector<8x64xf32> to vector<8x64xbf16>
    %c0_43 = arith.constant 0 : index
    %c0_44 = arith.constant 0 : index
    %139 = vector.load %arg12[%c0_43, %c0_44] : memref<64x32xbf16, #tpu.memory_space<vmem>>, vector<64x32xbf16>
    %cst_45 = arith.constant dense<0.000000e+00> : vector<8x32xf32>
    %140 = tpu.matmul %138, %139, %cst_45 {dimension_numbers = #tpu.dot_dimension_numbers<[1], [0], [0], [1], [0, 0, 1, 1], [], []>} : vector<8x64xbf16>, vector<64x32xbf16>, vector<8x32xf32> -> vector<8x32xf32>
    %c0_46 = arith.constant 0 : index
    %c0_47 = arith.constant 0 : index
    %141 = vector.load %arg13[%c0_46, %c0_47] : memref<1x32xf32, #tpu.memory_space<vmem>>, vector<1x32xf32>
    %142 = vector.broadcast %141 : vector<1x32xf32> to vector<8x32xf32>
    %143 = arith.addf %140, %142 : vector<8x32xf32>
    %144 = arith.addf %94, %143 : vector<8x32xf32>
    %c0_48 = arith.constant 0 : index
    %c0_49 = arith.constant 0 : index
    %c0_50 = arith.constant 0 : index
    %145 = vector.load %arg14[%c0_48, %c0_49, %c0_50] : memref<1x8x32xf32, #tpu.memory_space<vmem>>, vector<1x8x32xf32>
    %146 = vector.shape_cast %145 : vector<1x8x32xf32> to vector<8x32xf32>
    %147 = vector.shape_cast %144 : vector<8x32xf32> to vector<1x8x32xf32>
    tpu.vector_store %arg14[%c0_48, %c0_49, %c0_50], %147 {strides = array<i32>} : memref<1x8x32xf32, #tpu.memory_space<vmem>>, vector<1x8x32xf32>,
    return
  }
  func.func @transform_0(%arg0: i32) -> (i32, i32, i32) {
    %c0_i32 = arith.constant 0 : i32
    %c0_i32_0 = arith.constant 0 : i32
    %c0_i32_1 = arith.constant 0 : i32
    return %arg0, %c0_i32, %c0_i32_0 : i32, i32, i32
  }
  func.func @transform_1(%arg0: i32) -> (i32, i32) {
    %c0_i32 = arith.constant 0 : i32
    %c0_i32_0 = arith.constant 0 : i32
    %c0_i32_1 = arith.constant 0 : i32
    return %c0_i32, %c0_i32_0 : i32, i32
  }
  func.func @transform_2(%arg0: i32) -> (i32, i32) {
    %c0_i32 = arith.constant 0 : i32
    %c0_i32_0 = arith.constant 0 : i32
    %c0_i32_1 = arith.constant 0 : i32
    return %c0_i32, %c0_i32_0 : i32, i32
  }
  func.func @transform_3(%arg0: i32) -> (i32, i32) {
    %c0_i32 = arith.constant 0 : i32
    %c0_i32_0 = arith.constant 0 : i32
    %c0_i32_1 = arith.constant 0 : i32
    return %c0_i32, %c0_i32_0 : i32, i32
  }
  func.func @transform_4(%arg0: i32) -> (i32, i32) {
    %c0_i32 = arith.constant 0 : i32
    %c0_i32_0 = arith.constant 0 : i32
    %c0_i32_1 = arith.constant 0 : i32
    return %c0_i32, %c0_i32_0 : i32, i32
  }
  func.func @transform_5(%arg0: i32) -> (i32, i32) {
    %c0_i32 = arith.constant 0 : i32
    %c0_i32_0 = arith.constant 0 : i32
    %c0_i32_1 = arith.constant 0 : i32
    return %c0_i32, %c0_i32_0 : i32, i32
  }
  func.func @transform_6(%arg0: i32) -> (i32, i32) {
    %c0_i32 = arith.constant 0 : i32
    %c0_i32_0 = arith.constant 0 : i32
    %c0_i32_1 = arith.constant 0 : i32
    return %c0_i32, %c0_i32_0 : i32, i32
  }
  func.func @transform_7(%arg0: i32) -> (i32, i32) {
    %c0_i32 = arith.constant 0 : i32
    %c0_i32_0 = arith.constant 0 : i32
    %c0_i32_1 = arith.constant 0 : i32
    return %c0_i32, %c0_i32_0 : i32, i32
  }
  func.func @transform_8(%arg0: i32) -> (i32, i32) {
    %c0_i32 = arith.constant 0 : i32
    %c0_i32_0 = arith.constant 0 : i32
    %c0_i32_1 = arith.constant 0 : i32
    return %c0_i32, %c0_i32_0 : i32, i32
  }
  func.func @transform_9(%arg0: i32) -> (i32, i32) {
    %c0_i32 = arith.constant 0 : i32
    %c0_i32_0 = arith.constant 0 : i32
    %c0_i32_1 = arith.constant 0 : i32
    return %c0_i32, %c0_i32_0 : i32, i32
  }
  func.func @transform_10(%arg0: i32) -> (i32, i32) {
    %c0_i32 = arith.constant 0 : i32
    %c0_i32_0 = arith.constant 0 : i32
    %c0_i32_1 = arith.constant 0 : i32
    return %c0_i32, %c0_i32_0 : i32, i32
  }
  func.func @transform_11(%arg0: i32) -> (i32, i32) {
    %c0_i32 = arith.constant 0 : i32
    %c0_i32_0 = arith.constant 0 : i32
    %c0_i32_1 = arith.constant 0 : i32
    return %c0_i32, %c0_i32_0 : i32, i32
  }
  func.func @transform_12(%arg0: i32) -> (i32, i32) {
    %c0_i32 = arith.constant 0 : i32
    %c0_i32_0 = arith.constant 0 : i32
    %c0_i32_1 = arith.constant 0 : i32
    return %c0_i32, %c0_i32_0 : i32, i32
  }
  func.func @transform_13(%arg0: i32) -> (i32, i32, i32) {
    %c0_i32 = arith.constant 0 : i32
    %c0_i32_0 = arith.constant 0 : i32
    %c0_i32_1 = arith.constant 0 : i32
    return %arg0, %c0_i32, %c0_i32_0 : i32, i32, i32
  }
}

</mosaic_0001>

<bundles_post_ra>
// kernel: tpu_custom_call.1
= control target key start
LH: loop header
LB: loop body
LE: loop exit
PB: predicated region body
PF: predicated region fallthrough
CT: control target
= control target key end

     0   :  { %s2308_s0 = inlined_call_operand.vmem [shape: f32[2,8,32], index: 0, kind: input, shape index: {}]   ;;  %s2309_s1 = inlined_call_operand.vmem [shape: f32[1,32], index: 1, kind: input, shape index: {}]   ;;  %s2310_s2 = inlined_call_operand.vmem [shape: f32[1,32], index: 2, kind: input, shape index: {}]   ;;  %s2311_s3 = inlined_call_operand.vmem [shape: bf16[32,96], index: 3, kind: input, shape index: {}]   ;;  %s2312_s4 = inlined_call_operand.vmem [shape: f32[1,96], index: 4, kind: input, shape index: {}]   ;;  %s2313_s5 = inlined_call_operand.vmem [shape: bf16[32,32], index: 5, kind: input, shape index: {}]   ;;  %s2314_s6 = inlined_call_operand.vmem [shape: f32[1,32], index: 6, kind: input, shape index: {}]   ;;  %s2315_s7 = inlined_call_operand.hbm [shape: f32[1,32], index: 7, kind: input, shape index: {}]   ;;  %s2316_s8 = inlined_call_operand.hbm [shape: f32[1,32], index: 8, kind: input, shape index: {}]   ;;  %s2317_s9 = inlined_call_operand.hbm [shape: bf16[32,64], index: 9, kind: input, shape index: {}]   ;;  %s2318_s10 = inlined_call_operand.hbm [shape: f32[1,64], index: 10, kind: input, shape index: {}]   ;;  %s2319_s11 = inlined_call_operand.vmem [shape: bf16[64,32], index: 11, kind: input, shape index: {}]   ;;  %s2320_s12 = inlined_call_operand.vmem [shape: f32[1,32], index: 12, kind: input, shape index: {}]   ;;  %s2321_s13 = inlined_call_operand.hbm [shape: f32[2,8,32], index: 13, kind: output, shape index: {}]  }
   0x1   :  { %2327 = sst [smem:[#allocation18_spill]] %s2315_s7 }
   0x2   :  { %18 = vsyncpa [#allocation3], 0 }
   0x3   :  { %19 = vsyncpa [#allocation6], 0 }
   0x4   :  { %20 = vsyncpa [#allocation9], 0 }
   0x5   :  { %21 = vsyncpa [#allocation4], 0 }
   0x6   :  { %23 = vsyncpa [#allocation4 + $0x1], 0  ;;  %s1997_s25 = smov 0   ;;  %s1999_s26 = smov 0  }
   0x7   :  { %s2001_s27 = smov 0   ;;  %s2003_s28 = smov 0  }
   0x8 LB: > { %2328 = sst [smem:[#allocation15_spill]] %s1904_s27  ;;  %s2018_s29 = sadd.s32 4294967295, %s1908_s28   ;;  %s1908_s28 = sphi %s2003_s28, %s2344_s28   ;;  %s1904_s27 = sphi %s2001_s27, %s2346_s27   ;;  %s1900_s26 = sphi %s1999_s26, %s2348_s26   ;;  %s1896_s25 = sphi %s1997_s25, %s2347_s25  }
   0x9   : > { %s1446_s30 = sadd.s32 4294967294, %s1908_s28   ;;  %s2022_s14 = sadd.s32 1, %s1908_s28  }
   0xa   : > { %2329 = sst [smem:[#allocation16_spill]] %s2022_s14  ;;  %s314_s15 = sadd.s32 1, %s1904_s27 }
   0xb   : > { %s311_s16 = ssub.s32 %s1908_s28, %s2022_s14  ;;  %p324_p0 = scmp.ne.s32.totalorder %s1904_s27, %s1900_s26 }
   0xc   : > { %p312_p1 = scmp.eq.s32.totalorder %s311_s16, 0  ;;  %p325_p2 = scmp.eq.s32.totalorder %s2018_s29, 1 }
   0xd   : > { %p330_p3 = scmp.ne.s32.totalorder %s1900_s26, %s1896_s25  ;;  %p331_p4 = scmp.eq.s32.totalorder %s1446_s30, 1 }
   0xe   : > { %s2033_s17 = scalar_select %p312_p1, %s1904_s27, %s314_s15  }
   0xf   : > { %p2035_p5 = por %p325_p2, %p324_p0  ;;  %p2039_p6 = por %p331_p4, %p330_p3 }
  0x10   : > { %2330 = sst [smem:[#allocation17_spill]] %s2033_s17  ;;  %p1447_p7 = scmp.ge.s32.totalorder %s1908_s28, 1 }
  0x11   : > { %s2331_s18 = scalar_select %p2035_p5, 1, 0 }
  0x12   : > { %s2332_s19 = scalar_select %p2039_p6, 1, 0 }
  0x13   : > { %p338_p8 = scmp.lt.s32.totalorder %s1908_s28, 3  ;;  %p2323_p9 = scmp.eq.s32.totalorder %s2018_s29, 0 }
  0x14   : > { %s1910_s21 = smov [#allocation5]   ;;  %s1911_s23 = smov [#allocation2]  }
  0x15   : > { %p2046_p10 = pnand %p1447_p7, %p338_p8  ;;  %s380_s22 = sshll.u32 %s1910_s21, 4  ;;  %s381_s22 = int_to_ptr.vmem [resolvable:$true] %s380_s22 }
  0x16   : > { %s369_s24 = sshll.u32 %s1911_s23, 4  ;;  %s1912_s15 = smov [#allocation7]   ;;  %s370_s24 = int_to_ptr.vmem [resolvable:$true] %s369_s24 }
  0x17   : > { %p1626_p11 = pneg %p2046_p10  ;;  %s390_s16 = sshll.u32 %s1912_s15, 4  ;;  %s2058_s16 = int_to_ptr.vmem [resolvable:$true] %s390_s16 }
  0x18   : > { %s1743_s21 = scalar_lea.vmem %s381_s22, 16  ;;  %s1750_s23 = scalar_lea.vmem %s381_s22, 32 }
  0x19   : > { %p2054_p12 = pnand %p2323_p9, %p1626_p11  ;;  %p1744_p0 = scmp.ne.s32.totalorder %s381_s22, %s1743_s21 }
  0x1a   : > { %p1751_p3 = scmp.lt.s32.totalorder %s381_s22, %s381_s22  ;;  %p1752_p4 = scmp.lt.s32.totalorder %s1750_s23, %s1743_s21 }
  0x1b   : > { %p1734_p13 = pneg %p2054_p12 }
  0x1c   : > { %p1753_p7 = por %p1752_p4, %p1751_p3 }
  0x1d   : > { %p1746_p1 = pnand %p1744_p0, %p1734_p13 }
  0x1f   : > { %p1747_p2 = pneg %p1746_p1 }
  0x21   : > { %p1754_p8 = pnand %p1753_p7, %p1747_p2 }
  0x23   : > { %1757 = shalt.err (!%p1754_p8)
}
  0x24   : > { %1632 = dma.hbm_to_vmem [thread:$0]  (!%p2054_p12), %s2316_s8, 16, %s381_s22, [#allocation6]  }
  0x25   : > { %s1769_s27 = scalar_lea.vmem %s370_s24, 16  ;;  %s1776_s14 = scalar_lea.vmem %s370_s24, 32 }
  0x26   : > { %p1770_p11 = scmp.ne.s32.totalorder %s370_s24, %s1769_s27  ;;  %p1777_p1 = scmp.lt.s32.totalorder %s370_s24, %s370_s24 }
  0x27   : > { %p1778_p6 = scmp.lt.s32.totalorder %s1776_s14, %s1769_s27 }
  0x28   : > { %p1772_p9 = pnand %p1770_p11, %p1734_p13 }
  0x29   : > { %p1779_p5 = por %p1778_p6, %p1777_p1 }
  0x2a   : > { %p1773_p0 = pneg %p1772_p9 }
  0x2c   : > { %p1780_p3 = pnand %p1779_p5, %p1773_p0 }
  0x2e   : > { %1783 = shalt.err (!%p1780_p3)
}
  0x2f   : > { %s2335_s7 = sld [smem:[#allocation18_spill]]  ;;  %s1795_s17 = scalar_lea.vmem %s2058_s16, 256 }
  0x30   : > { %p1796_p2 = scmp.ne.s32.totalorder %s2058_s16, %s1795_s17  ;;  %p1803_p6 = scmp.lt.s32.totalorder %s2058_s16, %s2058_s16 }
  0x31   : > { %p1804_p5 = scmp.lt.s32.totalorder %s1795_s17, %s1795_s17 }
  0x32   : > { %p1798_p9 = pnand %p1796_p2, %p1734_p13 }
  0x33   : > { %p1805_p7 = por %p1804_p5, %p1803_p6 }
  0x34   : > { %p1799_p4 = pneg %p1798_p9 }
  0x35   : > { %1629 = dma.hbm_to_vmem [thread:$0]  (!%p2054_p12), %s2335_s7, 16, %s370_s24, [#allocation3]  }
  0x36   : > { %p1806_p8 = pnand %p1805_p7, %p1799_p4 }
  0x38   : > { %1809 = shalt.err (!%p1806_p8)
}
  0x39   : > { %s1913_s27 = smov 64   ;;  %s1914_s14 = smov 4  }
  0x3a   : > { %1635 = dma.hbm_to_vmem [thread:$0]  (!%p2054_p12), %s2317_s9, 256, %s2058_s16, [#allocation6], %s1913_s27, %s1913_s27, %s1914_s14  }
  0x3b   : > { %s1915_s15 = smov [#allocation8]  }
  0x3c   : > { %s404_s21 = sshll.u32 %s1915_s15, 4  ;;  %s405_s21 = int_to_ptr.vmem [resolvable:$true] %s404_s21 }
  0x3d   : > { %s1821_s23 = scalar_lea.vmem %s405_s21, 16  ;;  %s1828_s17 = scalar_lea.vmem %s405_s21, 32 }
  0x3e   : > { %p1822_p11 = scmp.ne.s32.totalorder %s405_s21, %s1821_s23  ;;  %p1829_p3 = scmp.lt.s32.totalorder %s405_s21, %s405_s21 }
  0x3f   : > { %p1830_p2 = scmp.lt.s32.totalorder %s1828_s17, %s1821_s23 }
  0x40   : > { %p1824_p0 = pnand %p1822_p11, %p1734_p13 }
  0x41   : > { %p1831_p9 = por %p1830_p2, %p1829_p3 }
  0x42   : > { %p1825_p1 = pneg %p1824_p0 }
  0x44   : > { %p1832_p4 = pnand %p1831_p9, %p1825_p1 }
  0x46   : > { %1835 = shalt.err (!%p1832_p4)
}
  0x47   : > { %1638 = dma.hbm_to_vmem [thread:$0]  (!%p2054_p12), %s2318_s10, 16, %s405_s21, [#allocation9]  }
  0x48   : > { %430 = sbr.rel (%p2046_p10) target bundleno = 2605 (0xa2d), region = 72  ;;  %p2336_p6 = scmp.eq.s32.totalorder (!%p2046_p10), %s2018_s29, 0 }
  0x4d   : > { %1879 = dma.done.wait (%p2336_p6), [#allocation3], 16   ;;  %p2337_p13 = pmov %p2336_p6 }
  0x4e   : > { %p2338_p5 = pmov %p2336_p6 }
  0x4f   : > { %1881 = vsyncadd (%p2337_p13), [#allocation3], 4294967280 }
  0x50   : > { %1883 = dma.done.wait (%p2338_p5), [#allocation6], 272   ;;  %p2339_p7 = pmov %p2338_p5 }
  0x51   : > { %p2340_p8 = pmov %p2338_p5 }
  0x52   : > { %1885 = vsyncadd (%p2339_p7), [#allocation6], 4294967024 }
  0x53   : > { %1887 = dma.done.wait (%p2340_p8), [#allocation9], 16   ;;  %p2341_p12 = pmov %p2338_p5 }
  0x54   : > { %p485_p10 = scmp.lt.s32.totalorder %s2018_s29, 1  ;;  %vm493_vm0 = vcmask 261120   ;;  %v1700_v7 = vld [vmem:[%s2311_s3 + $0x8] sm:$0xff]   ;;  %v1916_v8 = vmov 0.0   ;;  %vm1917_vm1 = vmmov 0   ;;  %v1701_v9 = vld [vmem:[%s2311_s3] sm:$0xff]  }
  0x55   : > { %1889 = vsyncadd (%p2341_p12), [#allocation9], 4294967280  ;;  %1524 = vmatprep.subr.bf16.mxu0 %v1916_v8  ;;  %1528 = vmatprep.mubr.msk.bf16.mxu0 %vm1917_vm1, %v1916_v8  ;;  %v1460_v14 = vld [vmem:[%s2309_s1] ss:$0 sm:$0xff]  ;;  %s1918_s16 = smov 104   ;;  %s1920_s14 = smov 112  }
  0x56   : > { %s486_s7 = scalar_select %p485_p10, %s2018_s29, 1  ;;  %1525 = vmatpush3.bf16.msra.mxu0 %v1700_v7  ;;  %1532 = vmatprep.subr.bf16.mxu1 %v1916_v8  ;;  %v1461_v16 = vld [vmem:[%s2310_s2] ss:$0 sm:$0xff]  ;;  %vm621_vm2 = vcmask 64512   ;;  %vm868_vm3 = vcmask 1043456   ;;  %vm1069_vm4 = vcmask 130048  }
  0x57   : > { %1526 = vmatprep.subr.bf16.mxu0 %v1916_v8  ;;  %1534 = vmatprep.mubr.msk.bf16.mxu1 %vm1917_vm1, %v1916_v8  ;;  %v1462_v20 = vld [vmem:[%s2312_s4] ss:$0 sm:$0xff]  ;;  %s1921_s24 = smov 96   ;;  %s1922_s15 = smov 64   ;;  %vm1071_vm5 = vcmask 195584   ;;  %vm1286_vm6 = vcmask 523264  }
  0x58   : > { %s1459_s20 = sshll.u32 %s486_s7, 3  ;;  %s1923_s7 = smov 8  }
  0x59   : > { %s488_s27 = scalar_lea.vmem %s2308_s0, %s1459_s20  ;;  %s1924_s20 = smov 16  }
  0x5a   : > { %v2118_v0 = vld [vmem:[%s488_s27] sm:$0xff]  ;;  %1527 = vmatpush3.bf16.msra.mxu0 %v1701_v9  ;;  %s1919_s27 = smov 120   ;;  %s1925_s30 = smov 24  }
  0x5b   : > { %v494_v1 = vsel %vm493_vm0, %v2118_v0, 0.0  ;;  %1538 = vmatprep.subr.bf16.mxu0 %v1916_v8  ;;  %p2342_p0 = scmp.ne.s32.totalorder %s2331_s18, 0 }
  0x5c   : > { %495 = vadd.xlane.f32.xlu0 %v494_v1 }
  0xe5   : > { %v496_v2 = vpop.xlane.xlu0 %495 }
  0xe6   : > { %v498_v3 = vmul.f32 0.03125, %v496_v2 }
  0xe8   : > { %v499_v4 = vsub.f32 %v2118_v0, %v498_v3 }
  0xea   : > { %v500_v5 = vmul.f32 %v499_v4, %v499_v4 }
  0xec   : > { %v501_v6 = vsel %vm493_vm0, %v500_v5, 0.0 }
  0xed   : > { %502 = vadd.xlane.f32.xlu0 %v501_v6 }
 0x176   : > { %v503_v10 = vpop.xlane.xlu0 %502 }
 0x177   : > { %v504_v11 = vmul.f32 0.03125, %v503_v10 }
 0x179   : > { %v505_v12 = vadd.f32 1e-06, %v504_v11 }
 0x17b   : > { %1710 = vrsqrt.f32 %v505_v12 }
 0x188   : > { %v1711_v13 = vpop.eup %1710 }
 0x189   : > { %v507_v15 = vmul.f32 %v1711_v13, %v499_v4 }
 0x18b   : > { %v514_v17 = vmul.f32 %v1460_v14, %v507_v15 }
 0x18d   : > { %v521_v18 = vadd.f32 %v1461_v16, %v514_v17 }
 0x18f   : > { %v522_v19 = vpack.c.bf16 %v521_v18, %v521_v18 }
 0x191   : > { %1529 = vmatmul.mubr.msk.bf16.vlgmr.msra.gmra.mxu0 %vm493_vm0, %v522_v19 }
 0x192   : > { %1540 = vmatprep.mubr.msk.bf16.mxu0 %vm1917_vm1, %v1916_v8 }
 0x251   : > { %v583_v21 = vpop.f32.mrf.mxu0 }
 0x252   : > { %v584_v22 = vadd.f32 %v1462_v20, %v583_v21 }
 0x253   : > { %v1530_v23 = vpop.f32.mrf.mxu0 }
 0x254   : > { %611 = vrot.lane.b32.xlu0 %v584_v22, %s1918_s16  ;;  %605 = vrot.lane.b32.xlu1 %v584_v22, %s1919_s27  ;;  %v589_v25 = vmul.f32 0.35355338, %v584_v22  ;;  %v2150_v27 = vpack.c.bf16 %v584_v22, %v584_v22 }
 0x255   : > { %v586_v24 = vpop.f32.mrf.mxu0 }
 0x256   : > { %v600_v36 = vpack.c.bf16 %v589_v25, %v589_v25 }
 0x257   : > { %v1531_v26 = vpop.f32.mrf.mxu0 }
 0x258   : > { %608 = vrot.lane.b32.xlu1 %v584_v22, %s1920_s14  ;;  %597 = vrot.lane.b32.xlu0 %v589_v25, %s1918_s16 }
 0x25c   : > { %619 = vrot.lane.b32.xlu1 %v2150_v27, %s1921_s24 }
 0x260   : > { %591 = vrot.lane.b32.xlu1 %v589_v25, %s1919_s27 }
 0x2c6   : > { %v606_v28 = vpop.permute.xlu1 %605  ;;  %v612_v32 = vpop.permute.xlu0 %611 }
 0x2c7   : > { %v2153_v29 = vpack.c.bf16 %v606_v28, %v606_v28  ;;  %v2159_v34 = vpack.c.bf16 %v612_v32, %v612_v32 }
 0x2c9   : > { %669 = vrot.lane.b32.xlu1 %v2153_v29, %s1921_s24 }
 0x2ca   : > { %v609_v30 = vpop.permute.xlu1 %608  ;;  %v598_v45 = vpop.permute.xlu0 %597 }
 0x2cb   : > { %v2156_v31 = vpack.c.bf16 %v609_v30, %v609_v30  ;;  %v603_v48 = vpack.c.bf16 %v598_v45, %v598_v45 }
 0x2cd   : > { %718 = vrot.lane.b32.xlu1 %v2156_v31, %s1921_s24 }
 0x2ce   : > { %v620_v33 = vpop.permute.xlu1 %619 }
 0x2cf   : > { %v626_v35 = vsel %vm621_vm2, %v620_v33, 0 }
 0x2d0   : > { %1533 = vmatpush3.bf16.xpose.msra.mxu1 %v626_v35 }
 0x2d1   : > { %767 = vrot.lane.b32.xlu1 %v2159_v34, %s1921_s24  ;;  %1544 = vmatprep.subr.bf16.mxu1 %v1916_v8 }
 0x2d2   : > { %v592_v37 = vpop.permute.xlu1 %591 }
 0x2d3   : > { %v601_v42 = vpack.c.bf16 %v592_v37, %v592_v37 }
 0x2d5   : > { %594 = vrot.lane.b32.xlu1 %v589_v25, %s1920_s14  ;;  %s1491_s14 = sshll.u32 %s2018_s29, 7 }
 0x2d6   : > { %s2266_s17 = scalar_lea.hbm %s2321_s13, %s1491_s14 }
 0x2d7   : > { %1535 = vmatmul.mubr.msk.bf16.vlgmr.msra.gmra.mxu1 %vm621_vm2, %v600_v36 }
 0x2d8   : > { %1546 = vmatprep.mubr.msk.bf16.mxu1 %vm1917_vm1, %v1916_v8 }
 0x33b   : > { %v670_v38 = vpop.permute.xlu1 %669 }
 0x33c   : > { %v675_v39 = vsel %vm621_vm2, %v670_v38, 0 }
 0x33d   : > { %1539 = vmatpush3.bf16.xpose.msra.mxu0 %v675_v39 }
 0x33e   : > { %1550 = vmatprep.subr.bf16.mxu0 %v1916_v8 }
 0x33f   : > { %v719_v40 = vpop.permute.xlu1 %718 }
 0x340   : > { %v724_v41 = vsel %vm621_vm2, %v719_v40, 0 }
 0x341   : > { %1545 = vmatpush3.bf16.xpose.msra.mxu1 %v724_v41 }
 0x342   : > { %1556 = vmatprep.subr.bf16.mxu1 %v1916_v8 }
 0x343   : > { %v768_v43 = vpop.permute.xlu1 %767 }
 0x344   : > { %v773_v44 = vsel %vm621_vm2, %v768_v43, 0  ;;  %1541 = vmatmul.mubr.msk.bf16.vlgmr.msra.gmra.mxu0 %vm621_vm2, %v601_v42 }
 0x345   : > { %1551 = vmatpush3.bf16.xpose.msra.mxu0 %v773_v44  ;;  %1552 = vmatprep.mubr.msk.bf16.mxu0 %vm1917_vm1, %v1916_v8 }
 0x346   : > { %1562 = vmatprep.subr.bf16.mxu0 %v1916_v8 }
 0x347   : > { %v595_v46 = vpop.permute.xlu1 %594 }
 0x348   : > { %v602_v47 = vpack.c.bf16 %v595_v46, %v595_v46 }
 0x34a   : > { %1547 = vmatmul.mubr.msk.bf16.vlgmr.msra.gmra.mxu1 %vm621_vm2, %v602_v47 }
 0x34b   : > { %1558 = vmatprep.mubr.msk.bf16.mxu1 %vm1917_vm1, %v1916_v8 }
 0x34c   : > { %1553 = vmatmul.mubr.msk.bf16.vlgmr.msra.gmra.mxu0 %vm621_vm2, %v603_v48 }
 0x34d   : > { %1564 = vmatprep.mubr.msk.bf16.mxu0 %vm1917_vm1, %v1916_v8 }
 0x397   : > { %v662_v49 = vpop.f32.mrf.mxu1 }
 0x398   : > { %v815_v50 = vsel %vm621_vm2, %v662_v49, -inf }
 0x399   : > { %816 = vmax.xlane.f32.xlu1 %v815_v50  ;;  %v1536_v51 = vpop.f32.mrf.mxu1 }
 0x39b   : > { %v665_v52 = vpop.f32.mrf.mxu1 }
 0x39d   : > { %v1537_v53 = vpop.f32.mrf.mxu1 }
 0x404   : > { %v711_v54 = vpop.f32.mrf.mxu0 }
 0x405   : > { %v818_v55 = vsel %vm621_vm2, %v711_v54, -inf }
 0x406   : > { %819 = vmax.xlane.f32.xlu0 %v818_v55  ;;  %v1542_v56 = vpop.f32.mrf.mxu0  ;;  %v1702_v55 = vld [vmem:[%s2313_s5 + $0x8] sm:$0xff]  }
 0x407   : > { %v1703_v56 = vld [vmem:[%s2313_s5] sm:$0xff]  }
 0x408   : > { %v714_v57 = vpop.f32.mrf.mxu0 }
 0x40a   : > { %v1543_v58 = vpop.f32.mrf.mxu0  ;;  %v760_v59 = vpop.f32.mrf.mxu1 }
 0x40b   : > { %v821_v60 = vsel %vm621_vm2, %v760_v59, -inf }
 0x40c   : > { %v1548_v61 = vpop.f32.mrf.mxu1  ;;  %822 = vmax.xlane.f32.xlu0 %v821_v60  ;;  %v809_v62 = vpop.f32.mrf.mxu0 }
 0x40d   : > { %v824_v63 = vsel %vm621_vm2, %v809_v62, -inf }
 0x40e   : > { %v763_v1 = vpop.f32.mrf.mxu1  ;;  %825 = vmax.xlane.f32.xlu1 %v824_v63  ;;  %v1554_v2 = vpop.f32.mrf.mxu0 }
 0x410   : > { %v1549_v3 = vpop.f32.mrf.mxu1  ;;  %v812_v4 = vpop.f32.mrf.mxu0 }
 0x412   : > { %v1555_v5 = vpop.f32.mrf.mxu0 }
 0x41f   : > { %912 = vrot.lane.b32.xlu1 %v2153_v29, %s1922_s15 }
 0x422   : > { %863 = vrot.lane.b32.xlu0 %v2150_v27, %s1922_s15  ;;  %v817_v6 = vpop.xlane.xlu1 %816 }
 0x423   : > { %v827_v7 = vsub.f32 %v662_v49, %v817_v6 }
 0x425   : > { %v831_v9 = vmul.f32 1.442695, %v827_v7 }
 0x427   : > { %1712 = vpow2.f32 %v831_v9 }
 0x434   : > { %v1713_v10 = vpop.eup %1712 }
 0x435   : > { %v839_v11 = vsel %vm621_vm2, %v1713_v10, 0.0 }
 0x441   : > { %840 = vadd.xlane.f32.xlu0 %v839_v11 }
 0x48f   : > { %v820_v12 = vpop.xlane.xlu0 %819 }
 0x490   : > { %v828_v13 = vsub.f32 %v711_v54, %v820_v12 }
 0x492   : > { %v833_v14 = vmul.f32 1.442695, %v828_v13 }
 0x494   : > { %1714 = vpow2.f32 %v833_v14  ;;  %v1474_v14 = vld [vmem:[%s2314_s6] ss:$0 sm:$0xff] }
 0x495   : > { %v823_v15 = vpop.xlane.xlu0 %822 }
 0x496   : > { %v829_v16 = vsub.f32 %v760_v59, %v823_v15 }
 0x497   : > { %v826_v17 = vpop.xlane.xlu1 %825 }
 0x498   : > { %v835_v18 = vmul.f32 1.442695, %v829_v16  ;;  %v830_v19 = vsub.f32 %v809_v62, %v826_v17 }
 0x499   : > { %v864_v20 = vpop.permute.xlu0 %863 }
 0x49a   : > { %1716 = vpow2.f32 %v835_v18  ;;  %v837_v21 = vmul.f32 1.442695, %v830_v19  ;;  %v870_v22 = vsel %vm868_vm3, %v864_v20, 0 }
 0x49b   : > { %1557 = vmatpush3.bf16.msra.mxu1 %v870_v22  ;;  %v913_v23 = vpop.permute.xlu1 %912 }
 0x49c   : > { %1718 = vpow2.f32 %v837_v21  ;;  %v918_v24 = vsel %vm868_vm3, %v913_v23, 0  ;;  %1568 = vmatprep.subr.bf16.mxu1 %v1916_v8 }
 0x49d   : > { %1563 = vmatpush3.bf16.msra.mxu0 %v918_v24 }
 0x49e   : > { %1574 = vmatprep.subr.bf16.mxu0 %v1916_v8 }
 0x4a1   : > { %v1715_v25 = vpop.eup %1714 }
 0x4a2   : > { %v842_v26 = vsel %vm621_vm2, %v1715_v25, 0.0 }
 0x4a3   : > { %843 = vadd.xlane.f32.xlu1 %v842_v26 }
 0x4a7   : > { %v1717_v27 = vpop.eup %1716 }
 0x4a8   : > { %v845_v28 = vsel %vm621_vm2, %v1717_v27, 0.0 }
 0x4a9   : > { %v1719_v29 = vpop.eup %1718  ;;  %846 = vadd.xlane.f32.xlu0 %v845_v28  ;;  %v1705_v28 = vld [vmem:[#allocation7] sm:$0xff]  }
 0x4aa   : > { %v848_v30 = vsel %vm621_vm2, %v1719_v29, 0.0 }
 0x4ab   : > { %849 = vadd.xlane.f32.xlu1 %v848_v30 }
 0x4bc   : > { %960 = vrot.lane.b32.xlu1 %v2156_v31, %s1922_s15 }
 0x4bf   : > { %1008 = vrot.lane.b32.xlu0 %v2159_v34, %s1922_s15 }
 0x4ca   : > { %v841_v32 = vpop.xlane.xlu0 %840 }
 0x4cb   : > { %1720 = vrcp.f32 %v841_v32 }
 0x4d8   : > { %v1721_v33 = vpop.eup %1720 }
 0x4d9   : > { %v852_v35 = vmul.f32 %v1721_v33, %v1713_v10  ;;  %v1478_v33 = vld [vmem:[#allocation2] ss:$0 sm:$0xff] }
 0x4db   : > { %v859_v36 = vpack.c.bf16 %v852_v35, %v852_v35 }
 0x4dd   : > { %1559 = vmatmul.mubr.msk.bf16.vlgmr.msra.gmra.mxu1 %vm621_vm2, %v859_v36  ;;  %v1479_v36 = vld [vmem:[#allocation5] ss:$0 sm:$0xff] }
 0x4de   : > { %1570 = vmatprep.mubr.msk.bf16.mxu1 %vm1917_vm1, %v1916_v8 }
 0x52c   : > { %v844_v37 = vpop.xlane.xlu1 %843 }
 0x52d   : > { %1722 = vrcp.f32 %v844_v37 }
 0x532   : > { %v847_v38 = vpop.xlane.xlu0 %846 }
 0x533   : > { %1724 = vrcp.f32 %v847_v38 }
 0x534   : > { %v850_v39 = vpop.xlane.xlu1 %849 }
 0x535   : > { %1726 = vrcp.f32 %v850_v39 }
 0x536   : > { %v1009_v42 = vpop.permute.xlu0 %1008 }
 0x537   : > { %v1014_v44 = vsel %vm868_vm3, %v1009_v42, 0  ;;  %v1480_v42 = vld [vmem:[#allocation8] ss:$0 sm:$0xff] }
 0x538   : > { %v961_v31 = vpop.permute.xlu1 %960 }
 0x539   : > { %v966_v40 = vsel %vm868_vm3, %v961_v31, 0  ;;  %v1706_v31 = vld [vmem:[%s2319_s11 + $0x18] sm:$0xff]  }
 0x53a   : > { %v1723_v34 = vpop.eup %1722  ;;  %1569 = vmatpush3.bf16.msra.mxu1 %v966_v40  ;;  %v1707_v40 = vld [vmem:[%s2319_s11 + $0x10] sm:$0xff]  }
 0x53b   : > { %v854_v41 = vmul.f32 %v1723_v34, %v1715_v25  ;;  %1580 = vmatprep.subr.bf16.mxu1 %v1916_v8  ;;  %v1708_v34 = vld [vmem:[%s2319_s11 + $0x8] sm:$0xff]  }
 0x53d   : > { %v860_v43 = vpack.c.bf16 %v854_v41, %v854_v41  ;;  %v1709_v41 = vld [vmem:[%s2319_s11] sm:$0xff]  }
 0x53f   : > { %1565 = vmatmul.mubr.msk.bf16.vlgmr.msra.gmra.mxu0 %vm621_vm2, %v860_v43 }
 0x540   : > { %v1725_v45 = vpop.eup %1724  ;;  %1575 = vmatpush3.bf16.msra.mxu0 %v1014_v44  ;;  %1576 = vmatprep.mubr.msk.bf16.mxu0 %vm1917_vm1, %v1916_v8 }
 0x541   : > { %v856_v46 = vmul.f32 %v1725_v45, %v1717_v27  ;;  %1588 = vmatprep.subr.bf16.mxu0 %v1916_v8  ;;  %v1704_v27 = vld [vmem:[#allocation7 + $0x8] sm:$0xff]  }
 0x542   : > { %v1727_v47 = vpop.eup %1726 }
 0x543   : > { %v861_v48 = vpack.c.bf16 %v856_v46, %v856_v46  ;;  %v858_v49 = vmul.f32 %v1727_v47, %v1719_v29 }
 0x545   : > { %1571 = vmatmul.mubr.msk.bf16.vlgmr.msra.gmra.mxu1 %vm621_vm2, %v861_v48  ;;  %v862_v50 = vpack.c.bf16 %v858_v49, %v858_v49 }
 0x546   : > { %1584 = vmatprep.mubr.msk.bf16.mxu1 %vm1917_vm1, %v1916_v8  ;;  %1581 = vmatpush3.bf16.msra.mxu1 %v1702_v55 }
 0x547   : > { %1577 = vmatmul.mubr.msk.bf16.vlgmr.msra.gmra.mxu0 %vm621_vm2, %v862_v50  ;;  %1582 = vmatprep.subr.bf16.mxu1 %v1916_v8 }
 0x548   : > { %1592 = vmatprep.mubr.msk.bf16.mxu0 %vm1917_vm1, %v1916_v8  ;;  %1589 = vmatpush3.bf16.msra.mxu0 %v1704_v27 }
 0x549   : > { %1590 = vmatprep.subr.bf16.mxu0 %v1916_v8 }
 0x54a   : > { %1583 = vmatpush3.bf16.msra.mxu1 %v1703_v56 }
 0x54b   : > { %1596 = vmatprep.subr.bf16.mxu1 %v1916_v8 }
 0x54c   : > { %1591 = vmatpush3.bf16.msra.mxu0 %v1705_v28 }
 0x59d   : > { %v906_v51 = vpop.f32.mrf.mxu1 }
 0x59f   : > { %v1560_v52 = vpop.f32.mrf.mxu1 }
 0x5a1   : > { %v909_v53 = vpop.f32.mrf.mxu1 }
 0x5a3   : > { %v1561_v54 = vpop.f32.mrf.mxu1 }
 0x5ff   : > { %v954_v57 = vpop.f32.mrf.mxu0 }
 0x600   : > { %1057 = vrot.lane.b32.xlu1 %v954_v57, %s1923_s7  ;;  %v1484_v57 = vld [vmem:[%s2320_s12] ss:$0 sm:$0xff]  ;;  %s1926_s7 = smov [#allocation10]  }
 0x601   : > { %v1566_v58 = vpop.f32.mrf.mxu0 }
 0x603   : > { %v957_v59 = vpop.f32.mrf.mxu0 }
 0x605   : > { %v1567_v60 = vpop.f32.mrf.mxu0  ;;  %v1002_v61 = vpop.f32.mrf.mxu1 }
 0x606   : > { %1061 = vrot.lane.b32.xlu0 %v1002_v61, %s1924_s20  ;;  %s482_s20 = sand.u32 1, %s1900_s26  }
 0x607   : > { %v1572_v62 = vpop.f32.mrf.mxu1  ;;  %v1050_v63 = vpop.f32.mrf.mxu0  ;;  %s1333_s29 = scalar_lea.sflag [#allocation4], %s482_s20 }
 0x608   : > { %1065 = vrot.lane.b32.xlu1 %v1050_v63, %s1925_s30  ;;  %s1458_s30 = sshll.u32 %s482_s20, 3 }
 0x609   : > { %v1005_v1 = vpop.f32.mrf.mxu1  ;;  %v1578_v2 = vpop.f32.mrf.mxu0  ;;  %s484_s24 = scalar_lea.vmem [#allocation10], %s1458_s30  ;;  %s1840_s30 = sshll.u32 %s1926_s7, 4  ;;  %s1841_s30 = int_to_ptr.vmem [resolvable:$false] %s1840_s30 }
 0x60a   : > { %s1346_s15 = sshll.u32 %s484_s24, 4  ;;  %s1842_s16 = scalar_lea.vmem %s1841_s30, 256  ;;  %s2268_s15 = int_to_ptr.vmem [resolvable:$true] %s1346_s15 }
 0x60b   : > { %v1573_v3 = vpop.f32.mrf.mxu1  ;;  %v1053_v4 = vpop.f32.mrf.mxu0  ;;  %s1836_s22 = scalar_lea.vmem %s2268_s15, 128  ;;  %p1843_p2 = scmp.lt.s32.totalorder %s2268_s15, %s1841_s30 }
 0x60c   : > { %p1837_p11 = scmp.ne.s32.totalorder %s2268_s15, %s1836_s22  ;;  %p1844_p9 = scmp.lt.s32.totalorder %s1842_s16, %s1836_s22 }
 0x60d   : > { %v1579_v5 = vpop.f32.mrf.mxu0 }
 0x60e   : > { %p1838_p1 = pnand %p1837_p11, %p2342_p0  ;;  %p1845_p4 = por %p1844_p9, %p1843_p2 }
 0x610   : > { %p1839_p3 = pneg %p1838_p1 }
 0x612   : > { %p1846_p6 = pnand %p1845_p4, %p1839_p3 }
 0x672   : > { %v1058_v6 = vpop.permute.xlu1 %1057 }
 0x673   : > { %v1068_v7 = vsel %vm621_vm2, %v906_v51, %v1058_v6 }
 0x678   : > { %v1062_v9 = vpop.permute.xlu0 %1061 }
 0x679   : > { %v1070_v10 = vsel %vm1069_vm4, %v1068_v7, %v1062_v9 }
 0x67a   : > { %v1066_v11 = vpop.permute.xlu1 %1065 }
 0x67b   : > { %v1072_v12 = vsel %vm1071_vm5, %v1070_v10, %v1066_v11 }
 0x67c   : > { %v1073_v13 = vpack.c.bf16 %v1072_v12, %v1072_v12 }
 0x67e   : > { %1585 = vmatmul.mubr.msk.bf16.vlgmr.msra.gmra.mxu1 %vm493_vm0, %v1073_v13 }
 0x67f   : > { %1604 = vmatprep.mubr.msk.bf16.mxu1 %vm1917_vm1, %v1916_v8  ;;  %1597 = vmatpush3.bf16.msra.mxu1 %v1706_v31 }
 0x680   : > { %1598 = vmatprep.subr.bf16.mxu1 %v1916_v8 }
 0x683   : > { %1599 = vmatpush3.bf16.msra.mxu1 %v1707_v40 }
 0x684   : > { %1600 = vmatprep.subr.bf16.mxu1 %v1916_v8 }
 0x687   : > { %1601 = vmatpush3.bf16.msra.mxu1 %v1708_v34 }
 0x688   : > { %1602 = vmatprep.subr.bf16.mxu1 %v1916_v8 }
 0x68b   : > { %1603 = vmatpush3.bf16.msra.mxu1 %v1709_v41 }
 0x73e   : > { %v1134_v15 = vpop.f32.mrf.mxu1 }
 0x73f   : > { %v1135_v16 = vadd.f32 %v1474_v14, %v1134_v15 }
 0x740   : > { %v1586_v17 = vpop.f32.mrf.mxu1 }
 0x741   : > { %v2234_v18 = vadd.f32 %v1135_v16, %v2118_v0 }
 0x742   : > { %v1137_v19 = vpop.f32.mrf.mxu1 }
 0x743   : > { %v1143_v20 = vsel %vm493_vm0, %v2234_v18, 0.0 }
 0x744   : > { %1144 = vadd.xlane.f32.xlu0 %v1143_v20  ;;  %v1587_v21 = vpop.f32.mrf.mxu1 }
 0x7cd   : > { %v1145_v22 = vpop.xlane.xlu0 %1144 }
 0x7ce   : > { %v1146_v23 = vmul.f32 0.03125, %v1145_v22 }
 0x7d0   : > { %v1147_v24 = vsub.f32 %v2234_v18, %v1146_v23 }
 0x7d2   : > { %v1148_v25 = vmul.f32 %v1147_v24, %v1147_v24 }
 0x7d4   : > { %v1149_v26 = vsel %vm493_vm0, %v1148_v25, 0.0 }
 0x7d5   : > { %1150 = vadd.xlane.f32.xlu1 %v1149_v26 }
 0x85e   : > { %v1151_v0 = vpop.xlane.xlu1 %1150 }
 0x85f   : > { %v1152_v29 = vmul.f32 0.03125, %v1151_v0 }
 0x861   : > { %v1153_v30 = vadd.f32 1e-06, %v1152_v29 }
 0x863   : > { %1728 = vrsqrt.f32 %v1153_v30 }
 0x870   : > { %v1729_v32 = vpop.eup %1728 }
 0x871   : > { %v1155_v35 = vmul.f32 %v1729_v32, %v1147_v24 }
 0x873   : > { %v1162_v37 = vmul.f32 %v1478_v33, %v1155_v35 }
 0x875   : > { %v1169_v38 = vadd.f32 %v1479_v36, %v1162_v37 }
 0x877   : > { %v1170_v39 = vpack.c.bf16 %v1169_v38, %v1169_v38 }
 0x879   : > { %1593 = vmatmul.mubr.msk.bf16.vlgmr.msra.gmra.mxu0 %vm493_vm0, %v1170_v39 }
 0x939   : > { %v1231_v43 = vpop.f32.mrf.mxu0 }
 0x93a   : > { %v1232_v44 = vadd.f32 %v1480_v42, %v1231_v43 }
 0x93b   : > { %v1594_v45 = vpop.f32.mrf.mxu0 }
 0x93c   : > { %v1238_v46 = vmul.f32 0.044715, %v1232_v44  ;;  %v1237_v54 = vmul.f32 0.5, %v1232_v44 }
 0x93d   : > { %v1234_v47 = vpop.f32.mrf.mxu0 }
 0x93e   : > { %v1239_v48 = vmul.f32 %v1238_v46, %v1232_v44 }
 0x93f   : > { %v1595_v49 = vpop.f32.mrf.mxu0 }
 0x940   : > { %v1240_v50 = vmul.f32 %v1239_v48, %v1232_v44 }
 0x942   : > { %v1241_v51 = vadd.f32 %v1240_v50, %v1232_v44 }
 0x944   : > { %v1242_v52 = vmul.f32 0.7978846, %v1241_v51 }
 0x946   : > { %1730 = vtanh.f32 %v1242_v52 }
 0x953   : > { %v1731_v53 = vpop.eup %1730 }
 0x954   : > { %v1244_v55 = vadd.f32 1.0, %v1731_v53 }
 0x956   : > { %v1245_v56 = vmul.f32 %v1244_v55, %v1237_v54 }
 0x958   : > { %v1246_v8 = vpack.c.bf16 %v1245_v56, %v1245_v56 }
 0x95a   : > { %1605 = vmatmul.mubr.msk.bf16.vlgmr.msra.gmra.mxu1 %vm1286_vm6, %v1246_v8 }
 0xa1a   : > { %v1324_v58 = vpop.f32.mrf.mxu1 }
 0xa1b   : > { %v1325_v59 = vadd.f32 %v1484_v57, %v1324_v58 }
 0xa1c   : > { %v1606_v60 = vpop.f32.mrf.mxu1 }
 0xa1d   : > { %v1330_v61 = vadd.f32 %v1325_v59, %v2234_v18 }
 0xa1e   : > { %v1327_v62 = vpop.f32.mrf.mxu1 }
 0xa1f   : > { %1331 = vst.msk [vmem:[%s484_s24] sm:$0xff] %vm493_vm0, %v1330_v61 }
 0xa20   : > { %v1607_v63 = vpop.f32.mrf.mxu1 }
 0xa21   : > { %1849 = shalt.err (!%p1846_p6)
}
 0xa22   : > { %s1850_s27 = scalar_lea.hbm %s2266_s17, 128  ;;  %s1854_s24 = scalar_lea.hbm %s2321_s13, 256 }
 0xa23   : > { %p1851_p13 = scmp.ne.s32.totalorder %s2266_s17, %s1850_s27  ;;  %p1855_p8 = scmp.lt.s32.totalorder %s2266_s17, %s2321_s13 }
 0xa24   : > { %p1856_p12 = scmp.lt.s32.totalorder %s1854_s24, %s1850_s27 }
 0xa25   : > { %p1852_p5 = pnand %p1851_p13, %p2342_p0 }
 0xa26   : > { %p1857_p10 = por %p1856_p12, %p1855_p8 }
 0xa27   : > { %p1853_p7 = pneg %p1852_p5 }
 0xa29   : > { %p1858_p11 = pnand %p1857_p10, %p1853_p7 }
 0xa2b   : > { %1861 = shalt.err (!%p1858_p11)
}
 0xa2c   : > { %1624 = dma.vmem_to_hbm [thread:$0]  (%p2342_p0), %s2268_s15, 128, %s2266_s17, %s1333_s29  }
 0xa2d PF: > { %p1651_p1 = scmp.ge.s32.totalorder %s1908_s28, 2  ;;  %s1358_s22 = sand.u32 1, %s1896_s25  }
 0xa2e   : > { %p2343_p3 = scmp.ne.s32.totalorder %s2332_s19, 0  ;;  %s1359_s7 = scalar_lea.sflag [#allocation4], %s1358_s22 }
 0xa30   : > { %p1640_p2 = pnand %p1651_p1, %p2343_p3 }
 0xa32   : > { %p1641_p9 = pneg %p1640_p2 }
 0xa34   : > { %1891 = dma.done.wait (%p1641_p9), %s1359_s7, 128  }
 0xa35   : > { %1893 = vsyncadd (%p1641_p9), %s1359_s7, 4294967168  ;;  %s2344_s28 = sld [smem:[#allocation16_spill]]  ;;  %s2347_s25 = smov %s1900_s26 }
 0xa36   : > { %s2345_s30 = sld [smem:[#allocation15_spill]] }
 0xa37   : > { %s2346_s27 = sld [smem:[#allocation17_spill]] }
 0xa3b   : > { %p26_p4 = scmp.ge.s32.totalorder %s2344_s28, 4  }
 0xa3c   : > { %s2348_s26 = smov %s2345_s30 }
 0xa3d   :  { %28 = sbr.rel (!%p26_p4) target bundleno = 8 (0x8), region = 124 }
 0xa42   :  { %1364 = vsyncpa [#allocation3], 1 }
 0xa43   :  { %1366 = vsyncpa [#allocation3 + $0x1], 1 }
 0xa44   :  { %1367 = vsyncpa [#allocation6], 1 }
 0xa45   :  { %1368 = vsyncpa [#allocation9], 1 }
 0xa46   :  { %1369 = vsyncpa [#allocation4], 1 }
 0xa47   :  { %1371 = vsyncpa [#allocation4 + $0x1], 1 }

</bundles_post_ra>
